<compile_context>
chip_gen: v7x
topology: tpu7x:2x2x1
jax: 0.10.0
libtpu: 0.0.40
codegen_flags: <defaults>
</compile_context>

<pallas_src>
import jax
import jax.numpy as jnp
from jax.experimental import pallas as pl
from jax.experimental.pallas import tpu as pltpu
import numpy as np


def _multitask_kernel(x_ref, wc_ref, wht_ref, bh_ref, out_ref):
    # x_ref  : (C_pad, N*HW)  channel C_in is the all-ones "bias channel"
    # wc_ref : (F, C_pad)     column C_in holds b_conv (bias folded into MXU K)
    # wht_ref: (OUT_PAD, F)   fused (hier|nat) head, pre-scaled by 1/HW
    # bh_ref : (OUT_PAD, 1)   fused head bias
    # out_ref: (OUT_PAD, N)   out^T; wrapper transposes + slices the tiny result
    n_batch = out_ref.shape[1]
    hw = x_ref.shape[1] // n_batch

    # "extract_features": 1x1 conv head (+ bias via the ones-channel) as one
    # 2-D MXU matmul over the fused N*HW lane axis.
    f = jnp.dot(wc_ref[...], x_ref[...],
                preferred_element_type=jnp.float32)        # (F, N*HW)
    f = f * jax.nn.sigmoid(f)                              # swish (VPU + EUP)

    # adaptive_avg_pool2d(., 1): per-batch cross-lane sum (XLU); the 1/HW scale
    # is folded into wht so no divide is needed here.
    pooled = jnp.concatenate(
        [jnp.sum(f[:, i * hw:(i + 1) * hw], axis=-1, keepdims=True)
         for i in range(n_batch)], axis=-1)                # (F, N)

    # Fused hierarchical+natural heads, emitted transposed so `pooled` stays in
    # its natural (F-on-sublanes) orientation: out^T = Wh^T @ pooled + b.
    out_ref[...] = (jnp.dot(wht_ref[...], pooled,
                            preferred_element_type=jnp.float32) + bh_ref[...])


@jax.jit
def multitask_forward(x_nchw, w_conv, b_conv, w_hier, b_hier, w_nat, b_nat):
    """x_nchw: (N, C_in, H, W) float32.  Returns (h_out, n_out)."""
    N, C_in, H, W = x_nchw.shape
    F_feat = w_conv.shape[1]
    num_h = w_hier.shape[1]
    num_n = w_nat.shape[1]
    HW = H * W

    num_out = num_h + num_n
    out_pad = max(128, pl.cdiv(num_out, 128) * 128)   # lane-dense fused head width
    c_pad = max(8, pl.cdiv(C_in + 1, 8) * 8)          # channels + bias channel, 8-sublane

    # NCHW -> (C_in, N*HW) channel-major slab (one small HBM relayout, fused by
    # XLA with the bias-channel concat below); append the all-ones bias channel
    # at index C_in and zero-pad remaining sublanes.
    # NOTE: at scale this pad/relayout is an extra HBM round trip on the largest
    # tensor; it is the price of folding b_conv into the MXU contraction.
    x = jnp.transpose(x_nchw.reshape(N, C_in, HW), (1, 0, 2)).reshape(C_in, N * HW)
    x = jnp.concatenate(
        [x,
         jnp.ones((1, N * HW), x.dtype),
         jnp.zeros((c_pad - C_in - 1, N * HW), x.dtype)], axis=0)        # (C_pad, N*HW)

    # Conv-head weight with b_conv folded into the bias-channel column.
    wc = jnp.concatenate(
        [w_conv.T,
         b_conv.reshape(F_feat, 1),
         jnp.zeros((F_feat, c_pad - C_in - 1), w_conv.dtype)], axis=1)   # (F, C_pad)

    # Fused heads: fold the 1/HW pooling scale in, transpose to (OUT_PAD, F);
    # zero-padded rows keep out columns num_out..out_pad exactly zero.
    w_heads = jnp.concatenate([w_hier, w_nat], axis=1) * (1.0 / HW)      # (F, num_out)
    wht = jnp.pad(w_heads.T, ((0, out_pad - num_out), (0, 0)))           # (OUT_PAD, F)
    bh = jnp.pad(jnp.concatenate([b_hier, b_nat], axis=0),
                 (0, out_pad - num_out)).reshape(out_pad, 1)             # (OUT_PAD, 1)

    vmem = pl.BlockSpec(memory_space=pltpu.MemorySpace.VMEM)
    out_t = pl.pallas_call(
        _multitask_kernel,
        out_shape=jax.ShapeDtypeStruct((out_pad, N), jnp.float32),
        in_specs=[vmem, vmem, vmem, vmem],
        out_specs=vmem,
    )(x, wc, wht, bh)

    out = out_t.T                                    # (N, OUT_PAD), tiny
    return out[:, :num_h], out[:, num_h:num_out]


def _reference(x_nchw, w_conv, b_conv, w_hier, b_hier, w_nat, b_nat):
    N, C_in, H, W = x_nchw.shape
    x = jnp.transpose(x_nchw, (0, 2, 3, 1)).reshape(N, H * W, C_in)
    f = jnp.einsum("nsc,cf->nsf", x, w_conv) + b_conv
    f = f * jax.nn.sigmoid(f)
    pooled = jnp.mean(f, axis=1)                     # (N, F)
    h = pooled @ w_hier + b_hier
    n = pooled @ w_nat + b_nat
    return h, n


if __name__ == "__main__":
    # Small shapes consistent with the forward:
    #   x: (N=2, C_in=4, H=16, W=16)
    #   in_features (conv-head out channels) = 32
    #   num_hierarchical_labels = 8, num_natural_labels = 5
    N, C_in, H, W = 2, 4, 16, 16
    F_feat, num_h, num_n = 32, 8, 5

    key = jax.random.PRNGKey(0)
    ks = jax.random.split(key, 7)
    x = jax.random.normal(ks[0], (N, C_in, H, W), dtype=jnp.float32)
    w_conv = jax.random.normal(ks[1], (C_in, F_feat), dtype=jnp.float32) * 0.1
    b_conv = jax.random.normal(ks[2], (F_feat,), dtype=jnp.float32) * 0.01
    # nn.Linear stores (out, in); we pre-transpose to (in, out) for the kernel.
    w_hier = jax.random.normal(ks[3], (F_feat, num_h), dtype=jnp.float32) * 0.1
    b_hier = jax.random.normal(ks[4], (num_h,), dtype=jnp.float32) * 0.01
    w_nat = jax.random.normal(ks[5], (F_feat, num_n), dtype=jnp.float32) * 0.1
    b_nat = jax.random.normal(ks[6], (num_n,), dtype=jnp.float32) * 0.01

    h_out, n_out = multitask_forward(x, w_conv, b_conv, w_hier, b_hier,
                                     w_nat, b_nat)
    jax.block_until_ready((h_out, n_out))

    h_ref, n_ref = _reference(x, w_conv, b_conv, w_hier, b_hier, w_nat, b_nat)
    np.testing.assert_allclose(np.asarray(h_out), np.asarray(h_ref),
                               rtol=1e-4, atol=1e-4)
    np.testing.assert_allclose(np.asarray(n_out), np.asarray(n_ref),
                               rtol=1e-4, atol=1e-4)
    assert h_out.shape == (N, num_h) and n_out.shape == (N, num_n)

    print("KERNEL_OK")
</pallas_src>

<mosaic_0001>
module attributes {stable_mosaic.version = 11 : i64} {
  func.func @_multitask_kernel(%arg0: memref<8x512xf32, #tpu.memory_space<vmem>>, %arg1: memref<32x8xf32, #tpu.memory_space<vmem>>, %arg2: memref<128x32xf32, #tpu.memory_space<vmem>>, %arg3: memref<128x1xf32, #tpu.memory_space<vmem>>, %arg4: memref<128x2xf32, #tpu.memory_space<vmem>>) attributes {dimension_semantics = [], scalar_prefetch = 0 : i64, scratch_operands = 0 : i64, tpu.core_type = #tpu.core_type<tc>} {
    %c0 = arith.constant 0 : index
    %c0_0 = arith.constant 0 : index
    %0 = vector.load %arg1[%c0, %c0_0] : memref<32x8xf32, #tpu.memory_space<vmem>>, vector<32x8xf32>
    %c0_1 = arith.constant 0 : index
    %c0_2 = arith.constant 0 : index
    %1 = vector.load %arg0[%c0_1, %c0_2] : memref<8x512xf32, #tpu.memory_space<vmem>>, vector<8x512xf32>
    %cst = arith.constant dense<0.000000e+00> : vector<32x512xf32>
    %2 = tpu.matmul %0, %1, %cst {dimension_numbers = #tpu.dot_dimension_numbers<[1], [0], [0], [1], [0, 0, 1, 1], [], []>} : vector<32x8xf32>, vector<8x512xf32>, vector<32x512xf32> -> vector<32x512xf32>
    %3 = arith.negf %2 : vector<32x512xf32>
    %4 = math.exp %3 : vector<32x512xf32>
    %cst_3 = arith.constant 1.000000e+00 : f32
    %5 = vector.broadcast %cst_3 : f32 to vector<32x512xf32>
    %6 = arith.addf %5, %4 : vector<32x512xf32>
    %7 = arith.divf %5, %6 : vector<32x512xf32>
    %8 = arith.mulf %2, %7 : vector<32x512xf32>
    %9 = vector.extract_strided_slice %8 {offsets = [0, 0], sizes = [32, 256], strides = [1, 1]} : vector<32x512xf32> to vector<32x256xf32>
    %cst_4 = arith.constant dense<0.000000e+00> : vector<32xf32>
    %10 = vector.multi_reduction <add>, %9, %cst_4 [1] : vector<32x256xf32> to vector<32xf32>
    %11 = vector.shape_cast %10 : vector<32xf32> to vector<32x1xf32>
    %12 = vector.extract_strided_slice %8 {offsets = [0, 256], sizes = [32, 256], strides = [1, 1]} : vector<32x512xf32> to vector<32x256xf32>
    %cst_5 = arith.constant dense<0.000000e+00> : vector<32xf32>
    %13 = vector.multi_reduction <add>, %12, %cst_5 [1] : vector<32x256xf32> to vector<32xf32>
    %14 = vector.shape_cast %13 : vector<32xf32> to vector<32x1xf32>
    %15 = tpu.concatenate %11, %14 in 1 : vector<32x1xf32>, vector<32x1xf32> -> vector<32x2xf32>
    %c0_6 = arith.constant 0 : index
    %c0_7 = arith.constant 0 : index
    %16 = vector.load %arg2[%c0_6, %c0_7] : memref<128x32xf32, #tpu.memory_space<vmem>>, vector<128x32xf32>
    %cst_8 = arith.constant dense<0.000000e+00> : vector<128x2xf32>
    %17 = tpu.matmul %16, %15, %cst_8 {dimension_numbers = #tpu.dot_dimension_numbers<[1], [0], [0], [1], [0, 0, 1, 1], [], []>} : vector<128x32xf32>, vector<32x2xf32>, vector<128x2xf32> -> vector<128x2xf32>
    %c0_9 = arith.constant 0 : index
    %c0_10 = arith.constant 0 : index
    %18 = vector.load %arg3[%c0_9, %c0_10] : memref<128x1xf32, #tpu.memory_space<vmem>>, vector<128x1xf32>
    %19 = vector.broadcast %18 : vector<128x1xf32> to vector<128x2xf32>
    %20 = arith.addf %17, %19 : vector<128x2xf32>
    %c0_11 = arith.constant 0 : index
    %c0_12 = arith.constant 0 : index
    %21 = vector.load %arg4[%c0_11, %c0_12] : memref<128x2xf32, #tpu.memory_space<vmem>>, vector<128x2xf32>
    tpu.vector_store %arg4[%c0_11, %c0_12], %20 {strides = array<i32>} : memref<128x2xf32, #tpu.memory_space<vmem>>, vector<128x2xf32>,
    return
  }
}

</mosaic_0001>

<bundles_post_ra>
// kernel: multitask_forward.1
= control target key start
LH: loop header
LB: loop body
LE: loop exit
PB: predicated region body
PF: predicated region fallthrough
CT: control target
= control target key end

     0   :  { %v856_v3 = vmov 0.0   ;;  %vm25_vm0 = vcmask 64512   ;;  %vm469_vm1 = vcmask 261120   ;;  %vm352_vm2 = vcmask 7168   ;;  %s1155_s0 = inlined_call_operand.vmem [shape: f32[8,512], index: 0, kind: input, shape index: {}]   ;;  %s1156_s1 = inlined_call_operand.vmem [shape: f32[32,8], index: 1, kind: input, shape index: {}]   ;;  %s1157_s2 = inlined_call_operand.vmem [shape: f32[128,32], index: 2, kind: input, shape index: {}]   ;;  %s1158_s3 = inlined_call_operand.vmem [shape: f32[128,1], index: 3, kind: input, shape index: {}]   ;;  %s1159_s4 = inlined_call_operand.vmem [shape: f32[128,2], index: 4, kind: output, shape index: {}]  }
   0x1   :  { %v22_v0 = vld [vmem:[%s1155_s0 + $0x8] sm:$0xff]  ;;  %v24_v1 = vld [vmem:[%s1155_s0 + $0x18] sm:$0xff]  ;;  %v21_v2 = vld [vmem:[%s1155_s0] sm:$0xff]  ;;  %102 = vmatprep.mubr.f32.mxu0 %v856_v3  ;;  %191 = vmatprep.mubr.f32.mxu1 %v856_v3  ;;  %vm663_vm3 = vcmask 15360  }
   0x2   :  { %38 = vmatprep.subr.mxu0 %v22_v0  ;;  %127 = vmatprep.subr.mxu1 %v24_v1  ;;  %v23_v4 = vld [vmem:[%s1155_s0 + $0x10] sm:$0xff]  ;;  %v17_v5 = vld [vmem:[%s1156_s1] sm:$0xff]  ;;  %v18_v6 = vld [vmem:[%s1156_s1 + $0x8] sm:$0xff] }
   0x3   :  { %39 = vmatpush1.msra.mxu0 %v21_v2  ;;  %128 = vmatpush1.msra.mxu1 %v23_v4  ;;  %v19_v7 = vld [vmem:[%s1156_s1 + $0x10] sm:$0xff]  ;;  %v20_v8 = vld [vmem:[%s1156_s1 + $0x18] sm:$0xff] }
   0x4   :  { %684 = vmatmul.mubr.msk.f32.vlgmr.msra.gmra.mrb[0].mxu0 %vm25_vm0, %v17_v5  ;;  %688 = vmatmul.mubr.msk.f32.vlgmr.msra.gmra.mrb[0].mxu1 %vm25_vm0, %v17_v5 }
   0x5   :  { %108 = vmatprep.mubr.f32.mxu0 %v856_v3  ;;  %197 = vmatprep.mubr.f32.mxu1 %v856_v3 }
   0x8   :  { %685 = vmatmul.mubr.msk.f32.gmra.mrb[2].mxu0 %vm25_vm0, %v18_v6  ;;  %689 = vmatmul.mubr.msk.f32.gmra.mrb[2].mxu1 %vm25_vm0, %v18_v6 }
   0x9   :  { %114 = vmatprep.mubr.f32.mxu0 %v856_v3  ;;  %203 = vmatprep.mubr.f32.mxu1 %v856_v3 }
   0xc   :  { %686 = vmatmul.mubr.msk.f32.gmra.mrb[4].mxu0 %vm25_vm0, %v19_v7  ;;  %690 = vmatmul.mubr.msk.f32.gmra.mrb[4].mxu1 %vm25_vm0, %v19_v7 }
   0xd   :  { %120 = vmatprep.mubr.f32.mxu0 %v856_v3  ;;  %209 = vmatprep.mubr.f32.mxu1 %v856_v3 }
  0x10   :  { %687 = vmatmul.mubr.msk.f32.gmra.mrb[6].mxu0 %vm25_vm0, %v20_v8  ;;  %691 = vmatmul.mubr.msk.f32.gmra.mrb[6].mxu1 %vm25_vm0, %v20_v8 }
  0xd7   :  { %v915_v9 = vpop.f32.mrb[0].mxu0  ;;  %v917_v10 = vpop.f32.mrb[0].mxu1 }
  0xd8   :  { %v692_v11 = vmul.f32 -1.442695, %v915_v9  ;;  %v694_v12 = vmul.f32 -1.442695, %v917_v10  ;;  %v921_v13 = vpop.f32.mrb[1].mxu0  ;;  %v923_v14 = vpop.f32.mrb[1].mxu1 }
  0xd9   :  { %v693_v15 = vmul.f32 -1.442695, %v921_v13  ;;  %v695_v16 = vmul.f32 -1.442695, %v923_v14 }
  0xda   :  { %792 = vpow2.f32 %v692_v11 }
  0xdb   :  { %794 = vpow2.f32 %v694_v12  ;;  %v927_v17 = vpop.f32.mrb[2].mxu0  ;;  %v929_v18 = vpop.f32.mrb[2].mxu1 }
  0xdc   :  { %796 = vpow2.f32 %v693_v15  ;;  %v696_v19 = vmul.f32 -1.442695, %v927_v17  ;;  %v698_v20 = vmul.f32 -1.442695, %v929_v18  ;;  %v933_v21 = vpop.f32.mrb[3].mxu0  ;;  %v935_v22 = vpop.f32.mrb[3].mxu1 }
  0xdd   :  { %798 = vpow2.f32 %v695_v16  ;;  %v697_v23 = vmul.f32 -1.442695, %v933_v21  ;;  %v699_v24 = vmul.f32 -1.442695, %v935_v22 }
  0xde   :  { %800 = vpow2.f32 %v696_v19 }
  0xdf   :  { %802 = vpow2.f32 %v698_v20  ;;  %v939_v25 = vpop.f32.mrb[4].mxu0  ;;  %v941_v26 = vpop.f32.mrb[4].mxu1 }
  0xe0   :  { %804 = vpow2.f32 %v697_v23  ;;  %v700_v27 = vmul.f32 -1.442695, %v939_v25  ;;  %v702_v28 = vmul.f32 -1.442695, %v941_v26  ;;  %v945_v29 = vpop.f32.mrb[5].mxu0  ;;  %v947_v30 = vpop.f32.mrb[5].mxu1 }
  0xe1   :  { %806 = vpow2.f32 %v699_v24  ;;  %v701_v31 = vmul.f32 -1.442695, %v945_v29  ;;  %v703_v32 = vmul.f32 -1.442695, %v947_v30 }
  0xe2   :  { %808 = vpow2.f32 %v700_v27 }
  0xe3   :  { %810 = vpow2.f32 %v702_v28  ;;  %v951_v33 = vpop.f32.mrb[6].mxu0  ;;  %v953_v34 = vpop.f32.mrb[6].mxu1 }
  0xe4   :  { %v793_v35 = vpop.eup %792  ;;  %812 = vpow2.f32 %v701_v31  ;;  %v704_v36 = vmul.f32 -1.442695, %v951_v33  ;;  %v956_v37 = vpop.f32.mrb[7].mxu0  ;;  %v706_v63 = vmul.f32 -1.442695, %v953_v34 }
  0xe5   :  { %v958_v38 = vpop.f32.mrb[7].mxu1  ;;  %v795_v39 = vpop.eup %794  ;;  %v264_v40 = vadd.f32 1.0, %v793_v35  ;;  %814 = vpow2.f32 %v703_v32  ;;  %v705_v1 = vmul.f32 -1.442695, %v956_v37 }
  0xe6   :  { %v797_v41 = vpop.eup %796  ;;  %v266_v42 = vadd.f32 1.0, %v795_v39  ;;  %816 = vpow2.f32 %v704_v36  ;;  %v707_v4 = vmul.f32 -1.442695, %v958_v38 }
  0xe7   :  { %v799_v43 = vpop.eup %798  ;;  %818 = vrcp.f32 %v264_v40  ;;  %v265_v44 = vadd.f32 1.0, %v797_v41 }
  0xe8   :  { %v801_v45 = vpop.eup %800  ;;  %820 = vrcp.f32 %v266_v42  ;;  %v267_v46 = vadd.f32 1.0, %v799_v43 }
  0xe9   :  { %v803_v47 = vpop.eup %802  ;;  %822 = vrcp.f32 %v265_v44  ;;  %v268_v48 = vadd.f32 1.0, %v801_v45 }
  0xea   :  { %v805_v49 = vpop.eup %804  ;;  %824 = vrcp.f32 %v267_v46  ;;  %v270_v50 = vadd.f32 1.0, %v803_v47 }
  0xeb   :  { %v807_v51 = vpop.eup %806  ;;  %826 = vrcp.f32 %v268_v48  ;;  %v269_v52 = vadd.f32 1.0, %v805_v49 }
  0xec   :  { %v809_v53 = vpop.eup %808  ;;  %828 = vrcp.f32 %v270_v50  ;;  %v271_v54 = vadd.f32 1.0, %v807_v51 }
  0xed   :  { %v811_v55 = vpop.eup %810  ;;  %830 = vrcp.f32 %v269_v52  ;;  %v272_v56 = vadd.f32 1.0, %v809_v53  ;;  %v357_v53 = vld [vmem:[%s1157_s2] sm:$0xff] }
  0xee   :  { %v813_v57 = vpop.eup %812  ;;  %832 = vrcp.f32 %v271_v54  ;;  %v274_v58 = vadd.f32 1.0, %v811_v55  ;;  %752 = vmatprep.mubr.msk.f32.mxu0 %vm469_vm1, %v357_v53  ;;  %v373_v54 = vld [vmem:[%s1158_s3] sm:$0xff]  ;;  %v382_v55 = vld [vmem:[%s1158_s3 + $0x48] sm:$0xff] }
  0xef   :  { %v815_v59 = vpop.eup %814  ;;  %834 = vrcp.f32 %v272_v56  ;;  %v273_v60 = vadd.f32 1.0, %v813_v57  ;;  %v376_v56 = vld [vmem:[%s1158_s3 + $0x18] sm:$0xff] }
  0xf0   :  { %v817_v61 = vpop.eup %816  ;;  %836 = vrcp.f32 %v274_v58  ;;  %v275_v62 = vadd.f32 1.0, %v815_v59  ;;  %v384_v57 = vld [vmem:[%s1158_s3 + $0x58] sm:$0xff]  ;;  %v377_v58 = vld [vmem:[%s1158_s3 + $0x20] sm:$0xff]  ;;  %v386_v59 = vld [vmem:[%s1158_s3 + $0x68] sm:$0xff] }
  0xf1   :  { %v819_v0 = vpop.eup %818  ;;  %838 = vrcp.f32 %v273_v60  ;;  %v276_v31 = vadd.f32 1.0, %v817_v61  ;;  %v378_v60 = vld [vmem:[%s1158_s3 + $0x28] sm:$0xff]  ;;  %v388_v61 = vld [vmem:[%s1158_s3 + $0x78] sm:$0xff] }
  0xf2   :  { %v821_v2 = vpop.eup %820  ;;  %v312_v3 = vmul.f32 %v819_v0, %v915_v9  ;;  %840 = vrcp.f32 %v275_v62  ;;  %v379_v62 = vld [vmem:[%s1158_s3 + $0x30] sm:$0xff]  ;;  %v381_v0 = vld [vmem:[%s1158_s3 + $0x40] sm:$0xff] }
  0xf3   :  { %v823_v5 = vpop.eup %822  ;;  %v314_v6 = vmul.f32 %v821_v2, %v917_v10  ;;  %842 = vpow2.f32 %v706_v63  ;;  %v380_v63 = vld [vmem:[%s1158_s3 + $0x38] sm:$0xff]  ;;  %v385_v2 = vld [vmem:[%s1158_s3 + $0x60] sm:$0xff] }
  0xf4   :  { %v825_v7 = vpop.eup %824  ;;  %v313_v8 = vmul.f32 %v823_v5, %v921_v13  ;;  %844 = vpow2.f32 %v705_v1  ;;  %v383_v1 = vld [vmem:[%s1158_s3 + $0x50] sm:$0xff] }
  0xf5   :  { %v827_v11 = vpop.eup %826  ;;  %v315_v12 = vmul.f32 %v825_v7, %v923_v14  ;;  %846 = vpow2.f32 %v707_v4 }
  0xf6   :  { %v829_v15 = vpop.eup %828  ;;  %v316_v16 = vmul.f32 %v827_v11, %v927_v17  ;;  %v328_v19 = vadd.f32 %v313_v8, %v312_v3  ;;  %848 = vrcp.f32 %v276_v31  ;;  %v387_v3 = vld [vmem:[%s1158_s3 + $0x70] sm:$0xff]  ;;  %v368_v31 = vld [vmem:[%s1157_s2 + $0x58] sm:$0xff] }
  0xf7   :  { %v831_v9 = vpop.eup %830  ;;  %v318_v20 = vmul.f32 %v829_v15, %v929_v18  ;;  %v340_v23 = vadd.f32 %v315_v12, %v314_v6 }
  0xf8   :  { %v833_v24 = vpop.eup %832  ;;  %v317_v10 = vmul.f32 %v831_v9, %v933_v21  ;;  %329 = vadd.xlane.f32.xlu0 %v328_v19 }
  0xf9   :  { %v835_v27 = vpop.eup %834  ;;  %v319_v13 = vmul.f32 %v833_v24, %v935_v22  ;;  %341 = vadd.xlane.f32.xlu1 %v340_v23 }
  0xfa   :  { %v837_v28 = vpop.eup %836  ;;  %v320_v14 = vmul.f32 %v835_v27, %v939_v25  ;;  %v331_v32 = vadd.f32 %v317_v10, %v316_v16  ;;  %v358_v10 = vld [vmem:[%s1157_s2 + $0x8] sm:$0xff] }
  0xfb   :  { %v839_v17 = vpop.eup %838  ;;  %v322_v35 = vmul.f32 %v837_v28, %v941_v26  ;;  %v343_v36 = vadd.f32 %v319_v13, %v318_v20  ;;  %v366_v27 = vld [vmem:[%s1157_s2 + $0x48] sm:$0xff]  ;;  %v359_v13 = vld [vmem:[%s1157_s2 + $0x10] sm:$0xff] }
  0xfc   :  { %v841_v39 = vpop.eup %840  ;;  %v321_v18 = vmul.f32 %v839_v17, %v945_v29  ;;  %332 = vadd.xlane.f32.xlu0 %v331_v32  ;;  %v367_v28 = vld [vmem:[%s1157_s2 + $0x50] sm:$0xff]  ;;  %v361_v32 = vld [vmem:[%s1157_s2 + $0x20] sm:$0xff] }
  0xfd   :  { %v323_v21 = vmul.f32 %v841_v39, %v947_v30  ;;  %344 = vadd.xlane.f32.xlu1 %v343_v36  ;;  %v843_v40 = vpop.eup %842  ;;  %v369_v17 = vld [vmem:[%s1157_s2 + $0x60] sm:$0xff]  ;;  %v370_v36 = vld [vmem:[%s1157_s2 + $0x68] sm:$0xff]  ;;  %v363_v39 = vld [vmem:[%s1157_s2 + $0x30] sm:$0xff] }
  0xfe   :  { %v334_v22 = vadd.f32 %v321_v18, %v320_v14  ;;  %v845_v41 = vpop.eup %844  ;;  %v278_v42 = vadd.f32 1.0, %v843_v40  ;;  %v360_v14 = vld [vmem:[%s1157_s2 + $0x18] sm:$0xff]  ;;  %v371_v18 = vld [vmem:[%s1157_s2 + $0x70] sm:$0xff] }
  0xff   :  { %v346_v43 = vadd.f32 %v323_v21, %v322_v35  ;;  %v847_v25 = vpop.eup %846  ;;  %v277_v44 = vadd.f32 1.0, %v845_v41  ;;  %v362_v35 = vld [vmem:[%s1157_s2 + $0x28] sm:$0xff]  ;;  %v364_v21 = vld [vmem:[%s1157_s2 + $0x38] sm:$0xff] }
 0x100   :  { %335 = vadd.xlane.f32.xlu0 %v334_v22  ;;  %850 = vrcp.f32 %v278_v42  ;;  %v279_v45 = vadd.f32 1.0, %v847_v25  ;;  %v849_v26 = vpop.eup %848  ;;  %v372_v40 = vld [vmem:[%s1157_s2 + $0x78] sm:$0xff] }
 0x101   :  { %852 = vrcp.f32 %v277_v44  ;;  %v324_v46 = vmul.f32 %v849_v26, %v951_v33  ;;  %v365_v33 = vld [vmem:[%s1157_s2 + $0x40] sm:$0xff] }
 0x102   :  { %854 = vrcp.f32 %v279_v45  ;;  %764 = vmatprep.mubr.msk.f32.mxu1 %vm469_vm1, %v365_v33 }
 0x104   :  { %347 = vadd.xlane.f32.xlu0 %v346_v43 }
 0x10a   :  { %v851_v29 = vpop.eup %850 }
 0x10b   :  { %v853_v30 = vpop.eup %852  ;;  %v326_v47 = vmul.f32 %v851_v29, %v953_v34  ;;  %v857_v34 = vmov 0  }
 0x10c   :  { %v855_v48 = vpop.eup %854  ;;  %v325_v49 = vmul.f32 %v853_v30, %v956_v37  ;;  %791 = vset.pattern.permute.xlu1 %v857_v34  ;;  %v374_v37 = vld [vmem:[%s1158_s3 + $0x8] sm:$0xff]  ;;  %790 = vset.pattern.permute.xlu0 %v857_v34 }
 0x10d   :  { %v327_v50 = vmul.f32 %v855_v48, %v958_v38  ;;  %v375_v38 = vld [vmem:[%s1158_s3 + $0x10] sm:$0xff] }
 0x10e   :  { %v337_v51 = vadd.f32 %v325_v49, %v324_v46 }
 0x10f   :  { %v349_v52 = vadd.f32 %v327_v50, %v326_v47 }
 0x110   :  { %338 = vadd.xlane.f32.xlu1 %v337_v51 }
 0x114   :  { %350 = vadd.xlane.f32.xlu1 %v349_v52 }
 0x11a   :  { %391 = vperm.xlu0 %790, %v373_v54  }
 0x11e   :  { %436 = vperm.xlu0 %790, %v382_v55  }
 0x122   :  { %446 = vperm.xlu0 %790, %v384_v57  }
 0x125   :  { %396 = vperm.xlu1 %791, %v374_v37  }
 0x126   :  { %456 = vperm.xlu0 %790, %v386_v59  }
 0x129   :  { %401 = vperm.xlu1 %791, %v375_v38  }
 0x12a   :  { %466 = vperm.xlu0 %790, %v388_v61  }
 0x12d   :  { %406 = vperm.xlu1 %791, %v376_v56  }
 0x131   :  { %411 = vperm.xlu1 %791, %v377_v58  }
 0x135   :  { %416 = vperm.xlu1 %791, %v378_v60  }
 0x139   :  { %421 = vperm.xlu1 %791, %v379_v62  }
 0x13d   :  { %426 = vperm.xlu1 %791, %v380_v63  }
 0x141   :  { %431 = vperm.xlu1 %791, %v381_v0  }
 0x145   :  { %441 = vperm.xlu1 %791, %v383_v1  }
 0x149   :  { %451 = vperm.xlu1 %791, %v385_v2  }
 0x14d   :  { %461 = vperm.xlu1 %791, %v387_v3  }
 0x185   :  { %v330_v4 = vpop.xlane.xlu0 %329 }
 0x186   :  { %v342_v5 = vpop.xlane.xlu1 %341 }
 0x187   :  { %v353_v8 = vsel %vm352_vm2, %v330_v4, %v342_v5 }
 0x189   :  { %v333_v6 = vpop.xlane.xlu0 %332 }
 0x18a   :  { %v345_v7 = vpop.xlane.xlu1 %344 }
 0x18b   :  { %v354_v11 = vsel %vm352_vm2, %v333_v6, %v345_v7 }
 0x18c   :  { %v776_v12 = vpack.c.bf16 %v354_v11, %v353_v8 }
 0x18d   :  { %v336_v15 = vpop.xlane.xlu0 %335 }
 0x18e   :  { %777 = vmatprep.subr.bf16.mxu0 %v776_v12  ;;  %784 = vmatprep.subr.bf16.mxu1 %v776_v12 }
 0x18f   :  { %779 = vmatpush3.bf16.msra.mxu0 %v776_v12  ;;  %786 = vmatpush3.bf16.msra.mxu1 %v776_v12 }
 0x191   :  { %v348_v19 = vpop.xlane.xlu0 %347 }
 0x192   :  { %v355_v20 = vsel %vm352_vm2, %v336_v15, %v348_v19 }
 0x199   :  { %v392_v26 = vpop.permute.xlu0 %391 }
 0x19d   :  { %v339_v16 = vpop.xlane.xlu1 %338  ;;  %v437_v46 = vpop.permute.xlu0 %436 }
 0x1a1   :  { %v351_v9 = vpop.xlane.xlu1 %350  ;;  %v447_v47 = vpop.permute.xlu0 %446 }
 0x1a2   :  { %v356_v23 = vsel %vm352_vm2, %v339_v16, %v351_v9 }
 0x1a3   :  { %v780_v24 = vpack.c.bf16 %v356_v23, %v355_v20 }
 0x1a5   :  { %781 = vmatprep.subr.bf16.mxu0 %v780_v24  ;;  %785 = vmatprep.subr.bf16.mxu1 %v780_v24  ;;  %v397_v22 = vpop.permute.xlu1 %396  ;;  %v457_v38 = vpop.permute.xlu0 %456 }
 0x1a6   :  { %783 = vmatpush3.bf16.msra.mxu0 %v780_v24  ;;  %787 = vmatpush3.bf16.msra.mxu1 %v780_v24 }
 0x1a9   :  { %753 = vmatmul.mubr.msk.f32.vlgmr.msra.gmra.mrb[8].mxu0 %vm469_vm1, %v358_v10  ;;  %765 = vmatmul.mubr.msk.f32.vlgmr.msra.gmra.mrb[8].mxu1 %vm469_vm1, %v366_v27  ;;  %v402_v41 = vpop.permute.xlu1 %401  ;;  %v467_v7 = vpop.permute.xlu0 %466 }
 0x1aa   :  { %755 = vmatprep.mubr.msk.f32.mxu0 %vm469_vm1, %v359_v13  ;;  %767 = vmatprep.mubr.msk.f32.mxu1 %vm469_vm1, %v367_v28 }
 0x1ad   :  { %756 = vmatmul.mubr.msk.f32.gmra.mrb[10].mxu0 %vm469_vm1, %v360_v14  ;;  %768 = vmatmul.mubr.msk.f32.gmra.mrb[10].mxu1 %vm469_vm1, %v368_v31  ;;  %v407_v42 = vpop.permute.xlu1 %406 }
 0x1ae   :  { %758 = vmatprep.mubr.msk.f32.mxu0 %vm469_vm1, %v361_v32  ;;  %770 = vmatprep.mubr.msk.f32.mxu1 %vm469_vm1, %v369_v17 }
 0x1b1   :  { %759 = vmatmul.mubr.msk.f32.gmra.mrb[12].mxu0 %vm469_vm1, %v362_v35  ;;  %771 = vmatmul.mubr.msk.f32.gmra.mrb[12].mxu1 %vm469_vm1, %v370_v36  ;;  %v412_v43 = vpop.permute.xlu1 %411 }
 0x1b2   :  { %761 = vmatprep.mubr.msk.f32.mxu0 %vm469_vm1, %v363_v39  ;;  %773 = vmatprep.mubr.msk.f32.mxu1 %vm469_vm1, %v371_v18 }
 0x1b5   :  { %762 = vmatmul.mubr.msk.f32.gmra.mrb[14].mxu0 %vm469_vm1, %v364_v21  ;;  %774 = vmatmul.mubr.msk.f32.gmra.mrb[14].mxu1 %vm469_vm1, %v372_v40  ;;  %v417_v25 = vpop.permute.xlu1 %416 }
 0x1b9   :  { %v422_v44 = vpop.permute.xlu1 %421 }
 0x1bd   :  { %v427_v45 = vpop.permute.xlu1 %426 }
 0x1c1   :  { %v432_v29 = vpop.permute.xlu1 %431 }
 0x1c5   :  { %v442_v30 = vpop.permute.xlu1 %441 }
 0x1c9   :  { %v452_v37 = vpop.permute.xlu1 %451 }
 0x1cd   :  { %v462_v6 = vpop.permute.xlu1 %461 }
 0x27c   :  { %v754_v48 = vpop.f32.mrb[8].mxu0  ;;  %v766_v49 = vpop.f32.mrb[8].mxu1 }
 0x27d   :  { %v590_v50 = vadd.f32 %v754_v48, %v397_v22  ;;  %v630_v51 = vadd.f32 %v766_v49, %v437_v46  ;;  %v624_v52 = vpop.f32.mrb[9].mxu1  ;;  %v584_v53 = vpop.f32.mrb[9].mxu0 }
 0x27e   :  { %v625_v33 = vadd.f32 %v624_v52, %v432_v29  ;;  %v585_v34 = vadd.f32 %v584_v53, %v392_v26 }
 0x27f   :  { %665 = vst.msk [vmem:[%s1159_s4 + $0x8] sm:$0xff] %vm663_vm3, %v590_v50  ;;  %673 = vst.msk [vmem:[%s1159_s4 + $0x48] sm:$0xff] %vm663_vm3, %v630_v51 }
 0x280   :  { %672 = vst.msk [vmem:[%s1159_s4 + $0x40] sm:$0xff] %vm663_vm3, %v625_v33  ;;  %664 = vst.msk [vmem:[%s1159_s4] sm:$0xff] %vm663_vm3, %v585_v34  ;;  %v757_v54 = vpop.f32.mrb[10].mxu0  ;;  %v769_v55 = vpop.f32.mrb[10].mxu1 }
 0x281   :  { %v600_v56 = vadd.f32 %v757_v54, %v407_v42  ;;  %v640_v57 = vadd.f32 %v769_v55, %v447_v47  ;;  %v594_v58 = vpop.f32.mrb[11].mxu0  ;;  %v634_v59 = vpop.f32.mrb[11].mxu1 }
 0x282   :  { %v595_v60 = vadd.f32 %v594_v58, %v402_v41  ;;  %v635_v61 = vadd.f32 %v634_v59, %v442_v30 }
 0x283   :  { %667 = vst.msk [vmem:[%s1159_s4 + $0x18] sm:$0xff] %vm663_vm3, %v600_v56  ;;  %675 = vst.msk [vmem:[%s1159_s4 + $0x58] sm:$0xff] %vm663_vm3, %v640_v57 }
 0x284   :  { %666 = vst.msk [vmem:[%s1159_s4 + $0x10] sm:$0xff] %vm663_vm3, %v595_v60  ;;  %674 = vst.msk [vmem:[%s1159_s4 + $0x50] sm:$0xff] %vm663_vm3, %v635_v61  ;;  %v760_v62 = vpop.f32.mrb[12].mxu0  ;;  %v772_v63 = vpop.f32.mrb[12].mxu1 }
 0x285   :  { %v610_v0 = vadd.f32 %v760_v62, %v417_v25  ;;  %v650_v1 = vadd.f32 %v772_v63, %v457_v38  ;;  %v604_v2 = vpop.f32.mrb[13].mxu0  ;;  %v644_v3 = vpop.f32.mrb[13].mxu1 }
 0x286   :  { %v605_v4 = vadd.f32 %v604_v2, %v412_v43  ;;  %v645_v5 = vadd.f32 %v644_v3, %v452_v37 }
 0x287   :  { %669 = vst.msk [vmem:[%s1159_s4 + $0x28] sm:$0xff] %vm663_vm3, %v610_v0  ;;  %677 = vst.msk [vmem:[%s1159_s4 + $0x68] sm:$0xff] %vm663_vm3, %v650_v1 }
 0x288   :  { %668 = vst.msk [vmem:[%s1159_s4 + $0x20] sm:$0xff] %vm663_vm3, %v605_v4  ;;  %676 = vst.msk [vmem:[%s1159_s4 + $0x60] sm:$0xff] %vm663_vm3, %v645_v5  ;;  %v763_v8 = vpop.f32.mrb[14].mxu0  ;;  %v775_v11 = vpop.f32.mrb[14].mxu1 }
 0x289   :  { %v620_v12 = vadd.f32 %v763_v8, %v427_v45  ;;  %v660_v15 = vadd.f32 %v775_v11, %v467_v7  ;;  %v614_v16 = vpop.f32.mrb[15].mxu0  ;;  %v654_v19 = vpop.f32.mrb[15].mxu1 }
 0x28a   :  { %v615_v9 = vadd.f32 %v614_v16, %v422_v44  ;;  %v655_v20 = vadd.f32 %v654_v19, %v462_v6 }
 0x28b   :  { %671 = vst.msk [vmem:[%s1159_s4 + $0x38] sm:$0xff] %vm663_vm3, %v620_v12  ;;  %679 = vst.msk [vmem:[%s1159_s4 + $0x78] sm:$0xff] %vm663_vm3, %v660_v15 }
 0x28c   :  { %670 = vst.msk [vmem:[%s1159_s4 + $0x30] sm:$0xff] %vm663_vm3, %v615_v9  ;;  %678 = vst.msk [vmem:[%s1159_s4 + $0x70] sm:$0xff] %vm663_vm3, %v655_v20 }

</bundles_post_ra>
